<compile_context>
chip_gen: v7x
topology: tpu7x:2x2x1
jax: 0.10.0
libtpu: 0.0.40
codegen_flags: <defaults>
</compile_context>

<pallas_src>
import numpy as np
import jax
import jax.numpy as jnp
from jax.experimental import pallas as pl
from jax.experimental.pallas import tpu as pltpu

# ------------------------- model hyperparameters -------------------------
ROW, COL = 4, 4
AREA = ROW * COL          # args.areaNum == number of graph nodes (16)
FEAT = 128                # node feature dim (lane-dense)
N_LAYERS = 3
BATCH = 8                 # samples per forward call
TB = 4                    # batch tile per grid step  -> grid = (BATCH // TB,)


# ------------------------- fused Pallas kernel -------------------------
def _gcn3_kernel(a_ref, x_ref, o_ref):
    """Three-layer GCN propagation for a tile of TB samples.

    a_ref : (N, N)       dense normalized adjacency (constant block, VMEM-resident)
    x_ref : (TB, N, F)   node-feature tile
    o_ref : (TB, N, F)   output after three propagations
    """
    a = a_ref[...]
    # Reassociated layer chain: A @ (A @ (A @ x)) == (A @ A @ A) @ x
    # -> two tiny (N,N)x(N,N) MXU passes, then one lane-dense pass per sample.
    a3 = jnp.dot(jnp.dot(a, a, preferred_element_type=jnp.float32), a,
                 preferred_element_type=jnp.float32)
    for b in range(TB):   # static unroll over the batch tile
        o_ref[b] = jnp.dot(a3, x_ref[b], preferred_element_type=jnp.float32)


def gcn_model_forward(a_dense, x):
    """GCNModel.forward(x, adj) for a batch of feature matrices, adj given dense."""
    bsz, n, f = x.shape
    assert bsz % TB == 0, "BATCH must be divisible by the batch tile TB"
    steps = bsz // TB
    flops = steps * (2 * 2 * n * n * n) + bsz * 2 * n * n * f
    bytes_accessed = 4 * (a_dense.size + 2 * x.size)
    return pl.pallas_call(
        _gcn3_kernel,
        out_shape=jax.ShapeDtypeStruct((bsz, n, f), jnp.float32),
        grid=(steps,),
        in_specs=[
            pl.BlockSpec((n, n), lambda i: (0, 0)),            # A: constant block, stays resident
            pl.BlockSpec((TB, n, f), lambda i: (i, 0, 0)),     # x: tiled over the batch
        ],
        out_specs=pl.BlockSpec((TB, n, f), lambda i: (i, 0, 0)),
        input_output_aliases={1: 0},                           # x buffer reused as the output
        compiler_params=pltpu.CompilerParams(
            dimension_semantics=("parallel",)),                # v7x: 2 TCs split the batch grid
        cost_estimate=pl.CostEstimate(flops=int(flops), transcendentals=0,
                                      bytes_accessed=int(bytes_accessed)),
    )(a_dense, x)


# ------------------------- graph construction (setup-time, numpy) -------------------------
def build_graph():
    """Deterministic 4-neighbour grid graph over ROW x COL, D^-1/2 A D^-1/2 normalized, dense."""
    adj = np.zeros((AREA, AREA), dtype=np.float32)
    for r in range(ROW):
        for c in range(COL):
            i = r * COL + c
            for dr, dc in ((1, 0), (-1, 0), (0, 1), (0, -1)):
                rr, cc = r + dr, c + dc
                if 0 <= rr < ROW and 0 <= cc < COL:
                    adj[i, rr * COL + cc] = 1.0
    deg = adj.sum(1)
    dinv = np.where(deg > 0, deg ** -0.5, 0.0)
    a_norm = (dinv[:, None] * adj * dinv[None, :]).astype(np.float32)   # edge vals == `new_t`
    return jnp.asarray(a_norm)


# ------------------------- main -------------------------
if __name__ == "__main__":
    key = jax.random.PRNGKey(0)
    x = jax.random.normal(key, (BATCH, AREA, FEAT), dtype=jnp.float32)
    a_dense = build_graph()

    # Snapshot inputs for the reference before x is donated to the kernel.
    x_np = np.asarray(x, dtype=np.float64)
    a_np = np.asarray(a_dense, dtype=np.float64)

    fwd = jax.jit(gcn_model_forward, donate_argnums=(1,))
    out = jax.block_until_ready(fwd(a_dense, x))

    # Pure reference: three dense propagations per sample, computed in float64.
    ref = x_np
    for _ in range(N_LAYERS):
        ref = np.einsum("ij,bjf->bif", a_np, ref)

    assert out.shape == (BATCH, AREA, FEAT)
    assert bool(jnp.all(jnp.isfinite(out)))
    np.testing.assert_allclose(np.asarray(out), ref, rtol=2e-3, atol=2e-3)
    print("KERNEL_OK")
</pallas_src>

<mosaic_0001>
module attributes {stable_mosaic.version = 11 : i64} {
  func.func @_gcn3_kernel(%arg0: i32, %arg1: memref<16x16xf32, #tpu.memory_space<vmem>>, %arg2: memref<4x16x128xf32, #tpu.memory_space<vmem>>, %arg3: memref<4x16x128xf32, #tpu.memory_space<vmem>>) attributes {dimension_semantics = [#tpu.dimension_semantics<parallel>], iteration_bounds = array<i64: 2>, scalar_prefetch = 0 : i64, scratch_operands = 0 : i64, tpu.core_type = #tpu.core_type<tc>, window_params = [{pipeline_mode = #tpu.pipeline_mode<synchronous>, transform_indices = @transform_0, window_bounds = array<i64: 16, 16>}, {transform_indices = @transform_1, window_bounds = array<i64: 4, 16, 128>}, {transform_indices = @transform_2, window_bounds = array<i64: 4, 16, 128>}]} {
    %c0 = arith.constant 0 : index
    %c0_0 = arith.constant 0 : index
    %0 = vector.load %arg1[%c0, %c0_0] : memref<16x16xf32, #tpu.memory_space<vmem>>, vector<16x16xf32>
    %cst = arith.constant dense<0.000000e+00> : vector<16x16xf32>
    %1 = tpu.matmul %0, %0, %cst {dimension_numbers = #tpu.dot_dimension_numbers<[1], [0], [0], [1], [0, 0, 1, 1], [], []>} : vector<16x16xf32>, vector<16x16xf32>, vector<16x16xf32> -> vector<16x16xf32>
    %cst_1 = arith.constant dense<0.000000e+00> : vector<16x16xf32>
    %2 = tpu.matmul %1, %0, %cst_1 {dimension_numbers = #tpu.dot_dimension_numbers<[1], [0], [0], [1], [0, 0, 1, 1], [], []>} : vector<16x16xf32>, vector<16x16xf32>, vector<16x16xf32> -> vector<16x16xf32>
    %c0_2 = arith.constant 0 : index
    %c0_3 = arith.constant 0 : index
    %c0_4 = arith.constant 0 : index
    %3 = vector.load %arg2[%c0_2, %c0_3, %c0_4] : memref<4x16x128xf32, #tpu.memory_space<vmem>>, vector<1x16x128xf32>
    %4 = vector.shape_cast %3 : vector<1x16x128xf32> to vector<16x128xf32>
    %cst_5 = arith.constant dense<0.000000e+00> : vector<16x128xf32>
    %5 = tpu.matmul %2, %4, %cst_5 {dimension_numbers = #tpu.dot_dimension_numbers<[1], [0], [0], [1], [0, 0, 1, 1], [], []>} : vector<16x16xf32>, vector<16x128xf32>, vector<16x128xf32> -> vector<16x128xf32>
    %c0_6 = arith.constant 0 : index
    %c0_7 = arith.constant 0 : index
    %c0_8 = arith.constant 0 : index
    %6 = vector.load %arg3[%c0_6, %c0_7, %c0_8] : memref<4x16x128xf32, #tpu.memory_space<vmem>>, vector<1x16x128xf32>
    %7 = vector.shape_cast %6 : vector<1x16x128xf32> to vector<16x128xf32>
    %8 = vector.shape_cast %5 : vector<16x128xf32> to vector<1x16x128xf32>
    tpu.vector_store %arg3[%c0_6, %c0_7, %c0_8], %8 {strides = array<i32>} : memref<4x16x128xf32, #tpu.memory_space<vmem>>, vector<1x16x128xf32>,
    %c1 = arith.constant 1 : index
    %c0_9 = arith.constant 0 : index
    %c0_10 = arith.constant 0 : index
    %9 = vector.load %arg2[%c1, %c0_9, %c0_10] : memref<4x16x128xf32, #tpu.memory_space<vmem>>, vector<1x16x128xf32>
    %10 = vector.shape_cast %9 : vector<1x16x128xf32> to vector<16x128xf32>
    %cst_11 = arith.constant dense<0.000000e+00> : vector<16x128xf32>
    %11 = tpu.matmul %2, %10, %cst_11 {dimension_numbers = #tpu.dot_dimension_numbers<[1], [0], [0], [1], [0, 0, 1, 1], [], []>} : vector<16x16xf32>, vector<16x128xf32>, vector<16x128xf32> -> vector<16x128xf32>
    %c1_12 = arith.constant 1 : index
    %c0_13 = arith.constant 0 : index
    %c0_14 = arith.constant 0 : index
    %12 = vector.load %arg3[%c1_12, %c0_13, %c0_14] : memref<4x16x128xf32, #tpu.memory_space<vmem>>, vector<1x16x128xf32>
    %13 = vector.shape_cast %12 : vector<1x16x128xf32> to vector<16x128xf32>
    %14 = vector.shape_cast %11 : vector<16x128xf32> to vector<1x16x128xf32>
    tpu.vector_store %arg3[%c1_12, %c0_13, %c0_14], %14 {strides = array<i32>} : memref<4x16x128xf32, #tpu.memory_space<vmem>>, vector<1x16x128xf32>,
    %c2 = arith.constant 2 : index
    %c0_15 = arith.constant 0 : index
    %c0_16 = arith.constant 0 : index
    %15 = vector.load %arg2[%c2, %c0_15, %c0_16] : memref<4x16x128xf32, #tpu.memory_space<vmem>>, vector<1x16x128xf32>
    %16 = vector.shape_cast %15 : vector<1x16x128xf32> to vector<16x128xf32>
    %cst_17 = arith.constant dense<0.000000e+00> : vector<16x128xf32>
    %17 = tpu.matmul %2, %16, %cst_17 {dimension_numbers = #tpu.dot_dimension_numbers<[1], [0], [0], [1], [0, 0, 1, 1], [], []>} : vector<16x16xf32>, vector<16x128xf32>, vector<16x128xf32> -> vector<16x128xf32>
    %c2_18 = arith.constant 2 : index
    %c0_19 = arith.constant 0 : index
    %c0_20 = arith.constant 0 : index
    %18 = vector.load %arg3[%c2_18, %c0_19, %c0_20] : memref<4x16x128xf32, #tpu.memory_space<vmem>>, vector<1x16x128xf32>
    %19 = vector.shape_cast %18 : vector<1x16x128xf32> to vector<16x128xf32>
    %20 = vector.shape_cast %17 : vector<16x128xf32> to vector<1x16x128xf32>
    tpu.vector_store %arg3[%c2_18, %c0_19, %c0_20], %20 {strides = array<i32>} : memref<4x16x128xf32, #tpu.memory_space<vmem>>, vector<1x16x128xf32>,
    %c3 = arith.constant 3 : index
    %c0_21 = arith.constant 0 : index
    %c0_22 = arith.constant 0 : index
    %21 = vector.load %arg2[%c3, %c0_21, %c0_22] : memref<4x16x128xf32, #tpu.memory_space<vmem>>, vector<1x16x128xf32>
    %22 = vector.shape_cast %21 : vector<1x16x128xf32> to vector<16x128xf32>
    %cst_23 = arith.constant dense<0.000000e+00> : vector<16x128xf32>
    %23 = tpu.matmul %2, %22, %cst_23 {dimension_numbers = #tpu.dot_dimension_numbers<[1], [0], [0], [1], [0, 0, 1, 1], [], []>} : vector<16x16xf32>, vector<16x128xf32>, vector<16x128xf32> -> vector<16x128xf32>
    %c3_24 = arith.constant 3 : index
    %c0_25 = arith.constant 0 : index
    %c0_26 = arith.constant 0 : index
    %24 = vector.load %arg3[%c3_24, %c0_25, %c0_26] : memref<4x16x128xf32, #tpu.memory_space<vmem>>, vector<1x16x128xf32>
    %25 = vector.shape_cast %24 : vector<1x16x128xf32> to vector<16x128xf32>
    %26 = vector.shape_cast %23 : vector<16x128xf32> to vector<1x16x128xf32>
    tpu.vector_store %arg3[%c3_24, %c0_25, %c0_26], %26 {strides = array<i32>} : memref<4x16x128xf32, #tpu.memory_space<vmem>>, vector<1x16x128xf32>,
    return
  }
  func.func @transform_0(%arg0: i32) -> (i32, i32) {
    %c0_i32 = arith.constant 0 : i32
    %c0_i32_0 = arith.constant 0 : i32
    %c0_i32_1 = arith.constant 0 : i32
    return %c0_i32, %c0_i32_0 : i32, i32
  }
  func.func @transform_1(%arg0: i32) -> (i32, i32, i32) {
    %c0_i32 = arith.constant 0 : i32
    %c0_i32_0 = arith.constant 0 : i32
    %c0_i32_1 = arith.constant 0 : i32
    return %arg0, %c0_i32, %c0_i32_0 : i32, i32, i32
  }
  func.func @transform_2(%arg0: i32) -> (i32, i32, i32) {
    %c0_i32 = arith.constant 0 : i32
    %c0_i32_0 = arith.constant 0 : i32
    %c0_i32_1 = arith.constant 0 : i32
    return %arg0, %c0_i32, %c0_i32_0 : i32, i32, i32
  }
}

</mosaic_0001>

<bundles_post_ra>
// kernel: gcn_model_forward.1
= control target key start
LH: loop header
LB: loop body
LE: loop exit
PB: predicated region body
PF: predicated region fallthrough
CT: control target
= control target key end

     0   :  { %7 = vsyncpa [#allocation3], 0  ;;  %s1355_s0 = inlined_call_operand.hbm [shape: f32[16,16], index: 0, kind: input, shape index: {}]   ;;  %s1356_s1 = inlined_call_operand.hbm [shape: f32[8,16,128], index: 1, kind: input, shape index: {}, may-alias: {1,2}]   ;;  %s1357_s2 = inlined_call_operand.hbm [shape: f32[8,16,128], index: 2, kind: output, shape index: {}, may-alias: {1,2}]  }
   0x1   :  { %8 = vsyncpa [#allocation6], 0 }
   0x2   :  { %10 = vsyncpa [#allocation6 + $0x1], 0 }
   0x3   :  { %11 = vsyncpa [#allocation4], 0 }
   0x4   :  { %13 = vsyncpa [#allocation4 + $0x1], 0  ;;  %s1122_s9 = smov 0   ;;  %s1124_s10 = smov 0  }
   0x5   :  { %s1126_s11 = smov 0   ;;  %s1128_s12 = smov 0  }
   0x6 LB: > { %s1143_s13 = sadd.s32 4294967295, %s1098_s12   ;;  %s773_s14 = sadd.s32 4294967294, %s1098_s12   ;;  %s1098_s12 = sphi %s1128_s12, %s1377_s12   ;;  %s1094_s11 = sphi %s1126_s11, %s1376_s11   ;;  %s1090_s10 = sphi %s1124_s10, %s1375_s10   ;;  %s1086_s9 = sphi %s1122_s9, %s1374_s9  }
   0x7   : > { %p60_p0 = scmp.ne.s32.totalorder %s1090_s10, %s1086_s9  ;;  %p1358_p1 = scmp.eq.s32.totalorder %s1143_s13, 0 }
   0x8   : > { %p90_p3 = scmp.eq.s32.totalorder %s773_s14, 1  ;;  %p774_p5 = scmp.ge.s32.totalorder %s1098_s12, 1 }
   0x9   : > { %p1152_p4 = por %p1358_p1, %p60_p0  ;;  %p97_p7 = scmp.lt.s32.totalorder %s1098_s12, 3 }
   0xa   : > { %p1157_p6 = por %p90_p3, %p60_p0  ;;  %s1100_s18 = smov [#allocation2]  }
   0xb   : > { %s1361_s15 = scalar_select %p1152_p4, 1, 0 }
   0xc   : > { %s1362_s16 = scalar_select %p1157_p6, 1, 0 }
   0xd   : > { %p1162_p8 = pnand %p774_p5, %p97_p7  ;;  %s109_s19 = sshll.u32 %s1100_s18, 4  ;;  %s1166_s19 = int_to_ptr.vmem [resolvable:$true] %s109_s19 }
   0xe   : > { %s1178_s21 = sadd.s32 1, %s1098_s12   ;;  %s47_s22 = sadd.s32 1, %s1094_s11 }
   0xf   : > { %s1363_s17 = scalar_select %p1162_p8, 1, 0 }
  0x10   : > { %p917_p9 = pneg %p1162_p8  ;;  %s44_s23 = ssub.s32 %s1098_s12, %s1178_s21 }
  0x11   : > { %s970_s26 = scalar_lea.hbm %s1355_s0, 256 }
  0x12   : > { %p1173_p11 = pnand %p917_p9, %p1358_p1  ;;  %p971_p12 = scmp.ne.s32.totalorder %s1355_s0, %s970_s26 }
  0x13   : > { %p977_p5 = scmp.lt.u32.totalorder %s970_s26, %s1355_s0 }
  0x14   : > { %p972_p13 = pneg %p1173_p11 }
  0x16   : > { %p973_p0 = pnand %p972_p13, %p971_p12 }
  0x18   : > { %p974_p3 = pneg %p973_p0 }
  0x1a   : > { %p979_p7 = pnand %p977_p5, %p974_p3 }
  0x1c   : > { %982 = shalt.err (!%p979_p7)
}
  0x1d   : > { %s983_s3 = scalar_lea.vmem %s1166_s19, 256  ;;  %p991_p2 = scmp.lt.s32.totalorder %s1166_s19, %s1166_s19 }
  0x1e   : > { %p984_p9 = scmp.ne.s32.totalorder %s1166_s19, %s983_s3  ;;  %p992_p6 = scmp.lt.s32.totalorder %s983_s3, %s983_s3 }
  0x20   : > { %p986_p10 = pnand %p984_p9, %p972_p13  ;;  %p993_p4 = por %p992_p6, %p991_p2 }
  0x22   : > { %p987_p1 = pneg %p986_p10 }
  0x24   : > { %p994_p8 = pnand %p993_p4, %p987_p1 }
  0x26   : > { %997 = shalt.err (!%p994_p8)
}
  0x27   : > { %s1101_s4 = smov 128   ;;  %s1102_s5 = smov 8  }
  0x28   : > { %920 = dma.hbm_to_vmem [thread:$0]  (!%p1173_p11), %s1355_s0, 256, %s1166_s19, [#allocation3], %s1101_s4, %s1101_s4, %s1102_s5  }
  0x29   : > { %p45_p1 = scmp.eq.s32.totalorder %s44_s23, 0  ;;  %p54_p2 = scmp.ne.s32.totalorder %s1094_s11, %s1090_s10 }
  0x2a   : > { %p55_p4 = scmp.eq.s32.totalorder %s1098_s12, 0  ;;  %p930_p6 = scmp.lt.s32.totalorder %s1098_s12, 2 }
  0x2b   : > { %s1212_s8 = scalar_select %p45_p1, %s1094_s11, %s47_s22  }
  0x2c   : > { %p56_p8 = por %p55_p4, %p54_p2  ;;  %p1365_p10 = scmp.eq.s32.totalorder %s1143_s13, 1 }
  0x2d   : > { %s123_s18 = sand.u32 1, %s1094_s11   ;;  %s816_s20 = sshll.u32 %s1098_s12, 10 }
  0x2e   : > { %p1216_p12 = por %p1365_p10, %p54_p2  ;;  %s777_s24 = sshll.u32 %s123_s18, 6 }
  0x2f   : > { %s1225_s27 = scalar_lea.hbm %s1356_s1, %s816_s20  ;;  %s127_s19 = scalar_lea.vmem [#allocation5], %s777_s24 }
  0x30   : > { %s135_s22 = sshll.u32 %s127_s19, 4  ;;  %p1227_p11 = pnand %p930_p6, %p56_p8  ;;  %s1231_s22 = int_to_ptr.vmem [resolvable:$true] %s135_s22 }
  0x31   : > { %s1233_s28 = scalar_lea.sflag [#allocation6], %s123_s18  ;;  %s998_s29 = scalar_lea.hbm %s1225_s27, 1024 }
  0x32   : > { %p999_p13 = scmp.ne.s32.totalorder %s1225_s27, %s998_s29  ;;  %p1000_p0 = pneg %p1227_p11 }
  0x33   : > { %s1003_s6 = scalar_lea.hbm %s1356_s1, 2048  ;;  %p1004_p7 = scmp.lt.u32.totalorder %s1225_s27, %s1356_s1 }
  0x34   : > { %p1001_p3 = pnand %p1000_p0, %p999_p13  ;;  %p1005_p9 = scmp.lt.u32.totalorder %s1003_s6, %s998_s29 }
  0x35   : > { %p1007_p2 = scmp.lt.u32.totalorder %s998_s29, %s1225_s27 }
  0x36   : > { %p1002_p5 = pneg %p1001_p3  ;;  %p1006_p1 = por %p1005_p9, %p1004_p7 }
  0x38   : > { %p1008_p4 = por %p1007_p2, %p1006_p1 }
  0x3a   : > { %p1009_p6 = pnand %p1008_p4, %p1002_p5 }
  0x3c   : > { %1012 = shalt.err (!%p1009_p6)
}
  0x3d   : > { %s1013_s18 = scalar_lea.vmem %s1231_s22, 1024  ;;  %s1103_s24 = smov [#allocation5]  }
  0x3e   : > { %p1014_p8 = scmp.ne.s32.totalorder %s1231_s22, %s1013_s18  ;;  %s1018_s25 = sshll.u32 %s1103_s24, 4  ;;  %s1019_s25 = int_to_ptr.vmem [resolvable:$false] %s1018_s25 }
  0x3f   : > { %s1020_s26 = scalar_lea.vmem %s1019_s25, 2048  ;;  %p1021_p3 = scmp.lt.s32.totalorder %s1231_s22, %s1019_s25 }
  0x40   : > { %p1016_p10 = pnand %p1014_p8, %p1000_p0  ;;  %p1022_p7 = scmp.lt.s32.totalorder %s1020_s26, %s1013_s18 }
  0x42   : > { %p1017_p13 = pneg %p1016_p10  ;;  %p1023_p9 = por %p1022_p7, %p1021_p3 }
  0x44   : > { %p1024_p1 = pnand %p1023_p9, %p1017_p13 }
  0x46   : > { %1027 = shalt.err (!%p1024_p1)
}
  0x47   : > { %924 = dma.hbm_to_vmem [thread:$0]  (!%p1227_p11), %s1225_s27, 1024, %s1231_s22, %s1233_s28, %s1101_s4, %s1101_s4, %s1102_s5  }
  0x48   : > { %p1368_p0 = scmp.ne.s32.totalorder %s1363_s17, 0 }
  0x49   : > { %p1369_p5 = scmp.eq.s32.totalorder (!%p1368_p0), %s1143_s13, 0 }
  0x4a   : > { %147 = sbr.rel (%p1368_p0) target bundleno = 753 (0x2f1), region = 28 }
  0x51   : > { %1073 = dma.done.wait (%p1369_p5), [#allocation3], 256   ;;  %p1370_p2 = pmov %p1369_p5 }
  0x52   : > { %s1271_s19 = sand.u32 1, %s1090_s10   ;;  %p1371_p11 = scmp.ne.s32.totalorder %s1361_s15, 0 }
  0x53   : > { %1075 = vsyncadd (%p1370_p2), [#allocation3], 4294967040  ;;  %s783_s23 = sshll.u32 %s1271_s19, 6  ;;  %s154_s29 = scalar_lea.sflag [#allocation6], %s1271_s19 }
  0x54   : > { %s1277_s4 = scalar_lea.vmem [#allocation5], %s783_s23 }
  0x55   : > { %1077 = dma.done.wait (%p1371_p11), %s154_s29, 1024  }
  0x56   : > { %1079 = vsyncadd (%p1371_p11), %s154_s29, 4294966272  ;;  %vm182_vm0 = vcmask 130048   ;;  %v180_v0 = vld [vmem:[#allocation2] sm:$0xff]  ;;  %v181_v1 = vld [vmem:[#allocation2 + $0x8] sm:$0xff]  ;;  %s177_s15 = scalar_lea.vmem [#allocation7], %s783_s23  ;;  %s818_s5 = sshll.u32 %s1143_s13, 10 }
  0x57   : > { %v885_v2 = vpack.c.bf16 %v181_v1, %v180_v0  ;;  %847 = vmatprep.mubr.msk.f32.mxu0 %vm182_vm0, %v180_v0  ;;  %v345_v3 = vld [vmem:[%s1277_s4] sm:$0xff]  ;;  %v346_v4 = vld [vmem:[%s1277_s4 + $0x8] sm:$0xff]  ;;  %v791_v5 = vld [vmem:[%s1277_s4 + $0x10] sm:$0xff]  ;;  %s688_s17 = sshll.u32 %s177_s15, 4  ;;  %s1311_s28 = scalar_lea.hbm %s1357_s2, %s818_s5  ;;  %s1306_s17 = int_to_ptr.vmem [resolvable:$true] %s688_s17 }
  0x58   : > { %v893_v6 = vpack.c.bf16 %v346_v4, %v345_v3  ;;  %v792_v7 = vld [vmem:[%s1277_s4 + $0x18] sm:$0xff]  ;;  %v797_v11 = vld [vmem:[%s1277_s4 + $0x20] sm:$0xff]  ;;  %v798_v12 = vld [vmem:[%s1277_s4 + $0x28] sm:$0xff]  ;;  %s674_s13 = scalar_lea.sflag [#allocation4], %s1271_s19  ;;  %s1028_s30 = scalar_lea.vmem %s1306_s17, 1024 }
  0x59   : > { %886 = vmatprep.subr.bf16.mxu0 %v885_v2  ;;  %890 = vmatprep.subr.bf16.mxu1 %v885_v2  ;;  %v897_v8 = vpack.c.bf16 %v792_v7, %v791_v5  ;;  %v803_v13 = vld [vmem:[%s1277_s4 + $0x30] sm:$0xff]  ;;  %v901_v14 = vpack.c.bf16 %v798_v12, %v797_v11  ;;  %v804_v15 = vld [vmem:[%s1277_s4 + $0x38] sm:$0xff]  ;;  %p1029_p4 = scmp.ne.s32.totalorder %s1306_s17, %s1028_s30  ;;  %s1104_s3 = smov [#allocation7]  }
  0x5a   : > { %888 = vmatpush3.bf16.msra.mxu0 %v885_v2  ;;  %892 = vmatpush3.bf16.msra.mxu1 %v885_v2  ;;  %v905_v16 = vpack.c.bf16 %v804_v15, %v803_v13  ;;  %s1032_s6 = sshll.u32 %s1104_s3, 4  ;;  %s1033_s6 = int_to_ptr.vmem [resolvable:$false] %s1032_s6 }
  0x5b   : > { %894 = vmatprep.subr.bf16.mxu0 %v893_v6  ;;  %898 = vmatprep.subr.bf16.mxu1 %v897_v8  ;;  %p1030_p6 = pnand %p1029_p4, %p1216_p12  ;;  %s1034_s7 = scalar_lea.vmem %s1033_s6, 2048 }
  0x5c   : > { %p1035_p10 = scmp.lt.s32.totalorder %s1306_s17, %s1033_s6  ;;  %p1036_p13 = scmp.lt.s32.totalorder %s1034_s7, %s1028_s30 }
  0x5d   : > { %848 = vmatmul.mubr.msk.f32.vlgmr.msra.gmra.mrb[0].mxu0 %vm182_vm0, %v181_v1  ;;  %p1031_p8 = pneg %p1030_p6 }
  0x5e   : > { %896 = vmatpush3.bf16.msra.mxu0 %v893_v6  ;;  %p1037_p3 = por %p1036_p13, %p1035_p10 }
  0x5f   : > { %902 = vmatprep.subr.bf16.mxu0 %v901_v14 }
  0x60   : > { %p1038_p7 = pnand %p1037_p3, %p1031_p8 }
 0x130   : > { %v849_v9 = vpop.f32.mrb[0].mxu0 }
 0x131   : > { %v255_v10 = vpop.f32.mrb[1].mxu0 }
 0x132   : > { %854 = vmatprep.mubr.msk.f32.mxu1 %vm182_vm0, %v255_v10 }
 0x133   : > { %855 = vmatmul.mubr.msk.f32.vlgmr.msra.gmra.mrb[0].mxu1 %vm182_vm0, %v849_v9 }
 0x134   : > { %900 = vmatpush3.bf16.msra.mxu1 %v897_v8 }
 0x135   : > { %906 = vmatprep.subr.bf16.mxu1 %v905_v16 }
 0x206   : > { %v856_v17 = vpop.f32.mrb[0].mxu1 }
 0x207   : > { %v336_v18 = vpop.f32.mrb[1].mxu1 }
 0x208   : > { %861 = vmatprep.mubr.msk.f32.mxu0 %vm182_vm0, %v336_v18  ;;  %868 = vmatprep.mubr.msk.f32.mxu1 %vm182_vm0, %v336_v18 }
 0x209   : > { %862 = vmatmul.mubr.msk.f32.vlgmr.msra.gmra.mrb[2].mxu0 %vm182_vm0, %v856_v17  ;;  %869 = vmatmul.mubr.msk.f32.vlgmr.msra.gmra.mrb[2].mxu1 %vm182_vm0, %v856_v17 }
 0x20a   : > { %904 = vmatpush3.bf16.msra.mxu0 %v901_v14  ;;  %908 = vmatpush3.bf16.msra.mxu1 %v905_v16 }
 0x20b   : > { %875 = vmatprep.mubr.msk.f32.mxu0 %vm182_vm0, %v336_v18  ;;  %882 = vmatprep.mubr.msk.f32.mxu1 %vm182_vm0, %v336_v18 }
 0x20d   : > { %876 = vmatmul.mubr.msk.f32.vlgmr.msra.gmra.mrb[4].mxu0 %vm182_vm0, %v856_v17  ;;  %883 = vmatmul.mubr.msk.f32.vlgmr.msra.gmra.mrb[4].mxu1 %vm182_vm0, %v856_v17 }
 0x2dc   : > { %v863_v19 = vpop.f32.mrb[2].mxu0  ;;  %v870_v20 = vpop.f32.mrb[2].mxu1 }
 0x2dd   : > { %429 = vst [vmem:[%s177_s15 + $0x8] sm:$0xff] %v863_v19  ;;  %796 = vst [vmem:[%s177_s15 + $0x18] sm:$0xff] %v870_v20  ;;  %v419_v21 = vpop.f32.mrb[3].mxu0  ;;  %v499_v22 = vpop.f32.mrb[3].mxu1 }
 0x2de   : > { %428 = vst [vmem:[%s177_s15] sm:$0xff] %v419_v21  ;;  %795 = vst [vmem:[%s177_s15 + $0x10] sm:$0xff] %v499_v22 }
 0x2e0   : > { %v877_v23 = vpop.f32.mrb[4].mxu0  ;;  %v884_v24 = vpop.f32.mrb[4].mxu1 }
 0x2e1   : > { %802 = vst [vmem:[%s177_s15 + $0x28] sm:$0xff] %v877_v23  ;;  %808 = vst [vmem:[%s177_s15 + $0x38] sm:$0xff] %v884_v24  ;;  %v580_v25 = vpop.f32.mrb[5].mxu0  ;;  %v661_v26 = vpop.f32.mrb[5].mxu1 }
 0x2e2   : > { %801 = vst [vmem:[%s177_s15 + $0x20] sm:$0xff] %v580_v25  ;;  %807 = vst [vmem:[%s177_s15 + $0x30] sm:$0xff] %v661_v26 }
 0x2e3   : > { %1041 = shalt.err (!%p1038_p7)
}
 0x2e4   : > { %s1042_s20 = scalar_lea.hbm %s1311_s28, 1024  ;;  %s1046_s25 = scalar_lea.hbm %s1357_s2, 2048 }
 0x2e5   : > { %p1043_p9 = scmp.ne.s32.totalorder %s1311_s28, %s1042_s20  ;;  %p1047_p5 = scmp.lt.u32.totalorder %s1311_s28, %s1357_s2 }
 0x2e6   : > { %p1048_p2 = scmp.lt.u32.totalorder %s1046_s25, %s1042_s20  ;;  %p1050_p4 = scmp.lt.u32.totalorder %s1042_s20, %s1311_s28 }
 0x2e7   : > { %p1044_p1 = pnand %p1043_p9, %p1216_p12 }
 0x2e8   : > { %p1049_p11 = por %p1048_p2, %p1047_p5 }
 0x2e9   : > { %p1045_p0 = pneg %p1044_p1 }
 0x2ea   : > { %p1051_p6 = por %p1050_p4, %p1049_p11 }
 0x2ec   : > { %p1052_p8 = pnand %p1051_p6, %p1045_p0 }
 0x2ee   : > { %1055 = shalt.err (!%p1052_p8)
}
 0x2ef   : > { %s1105_s29 = smov 128   ;;  %s1106_s4 = smov 8  }
 0x2f0   : > { %915 = dma.vmem_to_hbm [thread:$0]  (%p1216_p12), %s1306_s17, 1024, %s1311_s28, %s674_s13, %s1105_s29, %s1105_s29, %s1106_s4  }
 0x2f1 PF: > { %s703_s15 = sand.u32 1, %s1086_s9   ;;  %p1372_p10 = scmp.ne.s32.totalorder %s1362_s16, 0 }
 0x2f2   : > { %p1373_p13 = scmp.ge.s32.totalorder %s1098_s12, 2  ;;  %s704_s5 = scalar_lea.sflag [#allocation4], %s703_s15 }
 0x2f4   : > { %p926_p3 = pnand %p1373_p13, %p1372_p10 }
 0x2f6   : > { %1081 = dma.done.wait (!%p926_p3), %s704_s5, 1024  }
 0x2f7   : > { %1083 = vsyncadd (!%p926_p3), %s704_s5, 4294966272  ;;  %p16_p7 = scmp.ge.s32.totalorder %s1178_s21, 4   ;;  %s1374_s9 = smov %s1090_s10 }
 0x2f8   : > { %s1375_s10 = smov %s1094_s11  ;;  %s1376_s11 = smov %s1212_s8 }
 0x2f9   : > { %s1377_s12 = smov %s1178_s21  ;;  %18 = sbr.rel (!%p16_p7) target bundleno = 6 (0x6), region = 84 }
 0x300   :  { %709 = vsyncpa [#allocation3], 1 }
 0x301   :  { %711 = vsyncpa [#allocation3 + $0x1], 1 }
 0x302   :  { %712 = vsyncpa [#allocation6], 1 }
 0x303   :  { %714 = vsyncpa [#allocation6 + $0x1], 1 }
 0x304   :  { %715 = vsyncpa [#allocation4], 1 }
 0x305   :  { %717 = vsyncpa [#allocation4 + $0x1], 1 }

</bundles_post_ra>
